<compile_context>
chip_gen: v7x
topology: tpu7x:2x2x1
jax: 0.10.0
libtpu: 0.0.40
codegen_flags: <defaults>
</compile_context>

<pallas_src>
import jax
import jax.numpy as jnp
from jax import lax
from jax.experimental import pallas as pl
from jax.experimental.pallas import tpu as pltpu

# ----------------------------- model config ---------------------------------
EMBED = 32          # args.encoder_embed_dim
HEADS = 4           # args.encoder_attention_heads
HEAD_DIM = EMBED // HEADS
FFN = 64            # args.encoder_ffn_embed_dim
LN_EPS = 1e-5
NEG_INF = -1e30     # additive mask for padded keys
H_PAD = 8           # heads padded to a full sublane group

# ------------------- packed-weight layout (static offsets) -------------------
_W = 2 * EMBED                      # 64 packed columns
_R_WKV = 0                          # (C, 2C)   fused [Wk | Wv]
_R_QSEL = _R_WKV + EMBED            # (8, 2C)   q*scale on k-half head channels
_R_SELV = _R_QSEL + H_PAD           # (8, 2C)   1.0 on v-half head channels
_R_SCLS = _R_SELV + H_PAD           # (8, 1)    per-head CLS-key score (column 0)
_R_WO2 = _R_SCLS + H_PAD            # (2C, C)   [0 ; Wo]
_R_FC1 = _R_WO2 + 2 * EMBED         # (C, F)
_R_FC2 = _R_FC1 + EMBED             # (F, C)
_R_VEC = _R_FC2 + FFN               # 10 row-vectors follow
(_V_BKV, _V_KV0, _V_CLS, _V_BO, _V_LN1W, _V_LN1B,
 _V_FC1B, _V_FC2B, _V_LN2W, _V_LN2B) = range(10)
_R_TOTAL = _R_VEC + 10              # 226 rows total


def _round_up(a, m):
    return -(-a // m) * m


def _layer_norm(x, w, b):
    mu = jnp.mean(x, axis=-1, keepdims=True)
    var = jnp.mean((x - mu) ** 2, axis=-1, keepdims=True)
    return (x - mu) * lax.rsqrt(var + LN_EPS) * w + b


def _pack_params(params):
    """Pack all weights + CLS-derived constants into one (226, 64) f32 array."""
    C, H, D, F = EMBED, HEADS, HEAD_DIM, FFN
    f32 = jnp.float32
    cls = params["cls_token"].astype(f32)                                  # (1, C)
    wkv = jnp.concatenate([params["wk"], params["wv"]], axis=1)            # (C, 2C)
    bkv = jnp.concatenate([params["bk"], params["bv"]], axis=1)            # (1, 2C)
    q_scaled = (cls @ params["wq"] + params["bq"]) * (D ** -0.5)           # (1, C)
    kv0 = cls @ wkv + bkv                                                  # (1, 2C) CLS key|value

    # head selectors over the fused (k|v) channel axis
    ch = jnp.arange(2 * C)[None, :]
    hh = jnp.arange(H)[:, None]
    k_sel = ((ch < C) & ((ch // D) == hh)).astype(f32)                     # (H, 2C)
    v_sel = ((ch >= C) & (((ch - C) // D) == hh)).astype(f32)              # (H, 2C)
    q2 = jnp.concatenate([q_scaled, jnp.zeros((1, C), f32)], axis=1)       # (1, 2C)
    qsel = k_sel * q2                                                      # (H, 2C)
    s_cls = jnp.sum(qsel * kv0, axis=1)                                    # (H,) CLS-key scores

    pad_rows = lambda a: jnp.pad(a, ((0, H_PAD - a.shape[0]), (0, 0)))
    qsel8 = pad_rows(qsel)                                                 # (8, 2C)
    vsel8 = pad_rows(v_sel)                                                # (8, 2C)
    scls8 = jnp.zeros((H_PAD, _W), f32).at[:H, 0].set(s_cls)               # (8, 64)
    wo2 = jnp.concatenate([jnp.zeros((C, C), f32), params["wo"]], axis=0)  # (2C, C)

    padw = lambda a: jnp.pad(a.astype(f32), ((0, 0), (0, _W - a.shape[1])))
    blocks = [
        padw(wkv),                    # _R_WKV   (32 rows)
        qsel8,                        # _R_QSEL  (8)
        vsel8,                        # _R_SELV  (8)
        scls8,                        # _R_SCLS  (8)
        padw(wo2),                    # _R_WO2   (64)
        padw(params["fc1w"]),         # _R_FC1   (32)
        padw(params["fc2w"]),         # _R_FC2   (64)
        padw(bkv),                    # vectors (10 rows) in _V_* order
        padw(kv0),
        padw(cls),
        padw(params["bo"]),
        padw(params["ln1w"]), padw(params["ln1b"]),
        padw(params["fc1b"]), padw(params["fc2b"]),
        padw(params["ln2w"]), padw(params["ln2b"]),
    ]
    packed = jnp.concatenate(blocks, axis=0)
    assert packed.shape == (_R_TOTAL, _W), packed.shape
    return packed


# ------------------------------- kernel --------------------------------------
def _cls_pooler_kernel(x_ref, bias_ref, w_ref, o_ref):
    C, F, H8 = EMBED, FFN, H_PAD
    BB, Tp, _ = x_ref.shape

    # ---- packed weights (static slices of the single VMEM-resident buffer) ----
    wkv = w_ref[_R_WKV:_R_WKV + C, :]                     # (C, 2C)
    qsel = w_ref[_R_QSEL:_R_QSEL + H8, :]                 # (8, 2C)
    vsel = w_ref[_R_SELV:_R_SELV + H8, :]                 # (8, 2C)
    scls = w_ref[_R_SCLS:_R_SCLS + H8, 0:1]               # (8, 1)
    wo2 = w_ref[_R_WO2:_R_WO2 + 2 * C, :C]                # (2C, C)
    fc1w = w_ref[_R_FC1:_R_FC1 + C, :]                    # (C, F)
    fc2w = w_ref[_R_FC2:_R_FC2 + F, :C]                   # (F, C)
    vec = lambda i, n: w_ref[_R_VEC + i:_R_VEC + i + 1, :n]
    bkv = vec(_V_BKV, 2 * C)
    kv0 = vec(_V_KV0, 2 * C)
    cls = vec(_V_CLS, C)
    bo = vec(_V_BO, C)
    ln1w = vec(_V_LN1W, C)
    ln1b = vec(_V_LN1B, C)
    fc1b = vec(_V_FC1B, F)
    fc2b = vec(_V_FC2B, C)
    ln2w = vec(_V_LN2W, C)
    ln2b = vec(_V_LN2B, C)

    # ---- fused K|V projection of all data rows (Tp % 8 == 0 -> free reshape) ----
    x2 = x_ref[...].reshape(BB * Tp, C)
    kv = jnp.dot(x2, wkv, preferred_element_type=jnp.float32) + bkv       # (BB*Tp, 2C)
    kv3 = kv.reshape(BB, Tp, 2 * C)                                       # (BB, Tp, 2C)

    # ---- attention scores with keys on the LANE axis: (BB, 8, Tp) ----
    # qsel already folds the (constant-across-batch) scaled CLS query.
    qsel_b = jnp.broadcast_to(qsel[None], (BB, H8, 2 * C))
    s = lax.dot_general(qsel_b, kv3, (((2,), (2,)), ((0,), (0,))),
                        preferred_element_type=jnp.float32)               # (BB, 8, Tp)
    s = s + bias_ref[...][:, None, :]

    # ---- softmax over {CLS key, data keys}; CLS key is never padded ----
    scls3 = scls[None]                                                     # (1, 8, 1)
    m = jnp.maximum(jnp.max(s, axis=-1, keepdims=True), scls3)             # (BB, 8, 1)
    p = jnp.exp(s - m)                                                     # (BB, 8, Tp)
    p_cls = jnp.exp(scls3 - m)                                             # (BB, 8, 1)
    denom = jnp.sum(p, axis=-1, keepdims=True) + p_cls                     # (BB, 8, 1)

    ctx = p_cls * kv0[None]                                                # (BB, 8, 2C)
    ctx = ctx + lax.dot_general(p, kv3, (((2,), (1,)), ((0,), (0,))),
                                preferred_element_type=jnp.float32)
    ctx = ctx * pl.reciprocal(denom, approx=False)
    # pick, for each v-half channel, its own head; k-half channels become zero
    ctx = jnp.sum(ctx * vsel[None], axis=1)                                # (BB, 2C)

    attn = jnp.dot(ctx, wo2, preferred_element_type=jnp.float32) + bo      # (BB, C)

    # ---- residual + post-LN, ReLU FFN, residual + post-LN (CLS row only) ----
    h1 = _layer_norm(cls + attn, ln1w, ln1b)
    ff = jnp.maximum(jnp.dot(h1, fc1w, preferred_element_type=jnp.float32) + fc1b, 0.0)
    ff = jnp.dot(ff, fc2w, preferred_element_type=jnp.float32) + fc2b
    y = _layer_norm(h1 + ff, ln2w, ln2b)

    o_ref[...] = y                                                         # (BB, C)


# ------------------------------- wrapper --------------------------------------
def cls_pooler_forward(params, encoder_out_tbc, padding_mask_tb):
    """encoder_out_tbc: (T, B, C) float32; padding_mask_tb: (T, B) bool (True = padded)."""
    T, B, C = encoder_out_tbc.shape
    assert C == EMBED
    Tp = _round_up(max(T, 1), 8)                      # sublane-aligned time extent

    # batch-major activations; CLS row handled from packed weights (no concat needed)
    x = jnp.transpose(encoder_out_tbc, (1, 0, 2)).astype(jnp.float32)      # (B, T, C)
    x = jnp.pad(x, ((0, 0), (0, Tp - T), (0, 0)))
    bias = jnp.where(padding_mask_tb.T, jnp.float32(NEG_INF), jnp.float32(0.0))
    bias = jnp.pad(bias, ((0, 0), (0, Tp - T)), constant_values=NEG_INF)   # (B, Tp)

    # block sizing: keep the (lane-padded C->128) x block small enough for v7x's
    # 64 MiB VMEM, but big enough to amortize per-step pipeline overhead, and
    # prefer >= 4 grid blocks when the batch allows (2 TensorCores on v7x).
    ROWS_BUDGET = 8192                                # BB * Tp rows per block
    bb_cap = max(8, min(512, (ROWS_BUDGET // Tp) // 8 * 8))
    bb_target = max(8, _round_up(pl.cdiv(B, 4), 8))
    BB = min(bb_cap, bb_target)
    Bp = _round_up(B, BB)
    nblk = Bp // BB
    if Bp != B:
        x = jnp.pad(x, ((0, Bp - B), (0, 0), (0, 0)))
        bias = jnp.pad(bias, ((0, Bp - B), (0, 0)), constant_values=NEG_INF)

    wpack = _pack_params(params)                                           # (226, 64)

    out = pl.pallas_call(
        _cls_pooler_kernel,
        out_shape=jax.ShapeDtypeStruct((Bp, C), jnp.float32),
        grid=(nblk,),
        in_specs=[
            pl.BlockSpec((BB, Tp, C), lambda i: (i, 0, 0)),   # activations
            pl.BlockSpec((BB, Tp), lambda i: (i, 0)),         # 2D key-padding bias
            pl.BlockSpec(wpack.shape, lambda i: (0, 0)),      # packed weights (resident)
        ],
        out_specs=pl.BlockSpec((BB, C), lambda i: (i, 0)),
        compiler_params=pltpu.CompilerParams(
            dimension_semantics=("parallel",),
            vmem_limit_bytes=40 * 1024 * 1024),
    )(x, bias, wpack)

    return out[:B]                                                         # (B, C)


# --------------------------- pure-JAX reference --------------------------------
def reference_forward(params, encoder_out_tbc, padding_mask_tb):
    T, B, C = encoder_out_tbc.shape
    x = jnp.concatenate(
        [jnp.broadcast_to(params["cls_token"], (1, B, C)), encoder_out_tbc], axis=0)
    pad = jnp.concatenate([jnp.zeros((1, B), bool), padding_mask_tb], axis=0)
    x = jnp.transpose(x, (1, 0, 2))                                          # (B, T1, C)
    bias = jnp.where(pad.T, NEG_INF, 0.0)[:, None, None, :]                  # (B,1,1,T1)

    q = x @ params["wq"] + params["bq"]
    k = x @ params["wk"] + params["bk"]
    v = x @ params["wv"] + params["bv"]
    B_, T1, _ = x.shape
    split = lambda t: t.reshape(B_, T1, HEADS, HEAD_DIM).transpose(0, 2, 1, 3)
    s = jnp.einsum("bhqd,bhkd->bhqk", split(q) * (HEAD_DIM ** -0.5), split(k)) + bias
    p = jax.nn.softmax(s, axis=-1)
    ctx = jnp.einsum("bhqk,bhkd->bhqd", p, split(v)).transpose(0, 2, 1, 3).reshape(B_, T1, C)
    attn = ctx @ params["wo"] + params["bo"]
    h1 = _layer_norm(x + attn, params["ln1w"], params["ln1b"])
    ff = jnp.maximum(h1 @ params["fc1w"] + params["fc1b"], 0.0) @ params["fc2w"] + params["fc2b"]
    y = _layer_norm(h1 + ff, params["ln2w"], params["ln2b"])
    return y[:, 0, :]


# ------------------------------ params init ------------------------------------
def init_params(key):
    C, F = EMBED, FFN
    ks = jax.random.split(key, 13)
    w = lambda k, shape: 0.02 * jax.random.normal(k, shape, jnp.float32)
    return dict(
        cls_token=w(ks[12], (1, C)),
        wq=w(ks[0], (C, C)), bq=w(ks[1], (1, C)),
        wk=w(ks[2], (C, C)), bk=w(ks[3], (1, C)),
        wv=w(ks[4], (C, C)), bv=w(ks[5], (1, C)),
        wo=w(ks[6], (C, C)), bo=w(ks[7], (1, C)),
        ln1w=jnp.ones((1, C), jnp.float32), ln1b=jnp.zeros((1, C), jnp.float32),
        fc1w=w(ks[8], (C, F)), fc1b=w(ks[9], (1, F)),
        fc2w=w(ks[10], (F, C)), fc2b=w(ks[11], (1, C)),
        ln2w=jnp.ones((1, C), jnp.float32), ln2b=jnp.zeros((1, C), jnp.float32),
    )


# ---------------------------------- main ----------------------------------------
if __name__ == "__main__":
    key = jax.random.PRNGKey(0)
    k_x, k_params, k_x2 = jax.random.split(key, 3)
    params = init_params(k_params)

    # test 1: T already a multiple of 8
    T, B = 8, 2
    encoder_out = jax.random.normal(k_x, (T, B, EMBED), jnp.float32)        # (T, B, C)
    lengths = jnp.array([T, T - 3])
    padding_mask = jnp.arange(T)[:, None] >= lengths[None, :]               # (T, B) bool
    out = jax.block_until_ready(cls_pooler_forward(params, encoder_out, padding_mask))
    ref = reference_forward(params, encoder_out, padding_mask)
    assert out.shape == (B, EMBED), out.shape
    err1 = float(jnp.max(jnp.abs(out - ref)))
    assert err1 < 2e-3, f"mismatch vs reference (test 1): {err1}"

    # test 2: ragged T / B exercise the time- and batch-padding paths
    T2, B2 = 13, 5
    encoder_out2 = jax.random.normal(k_x2, (T2, B2, EMBED), jnp.float32)
    lengths2 = jnp.array([13, 10, 7, 13, 1])
    padding_mask2 = jnp.arange(T2)[:, None] >= lengths2[None, :]
    out2 = jax.block_until_ready(cls_pooler_forward(params, encoder_out2, padding_mask2))
    ref2 = reference_forward(params, encoder_out2, padding_mask2)
    assert out2.shape == (B2, EMBED), out2.shape
    err2 = float(jnp.max(jnp.abs(out2 - ref2)))
    assert err2 < 2e-3, f"mismatch vs reference (test 2): {err2}"

    print("KERNEL_OK")
</pallas_src>

<mosaic_0001>
module attributes {stable_mosaic.version = 11 : i64} {
  func.func @_cls_pooler_kernel(%arg0: i32, %arg1: memref<8x8x32xf32, #tpu.memory_space<vmem>>, %arg2: memref<8x8xf32, #tpu.memory_space<vmem>>, %arg3: memref<226x64xf32, #tpu.memory_space<vmem>>, %arg4: memref<8x32xf32, #tpu.memory_space<vmem>>) attributes {dimension_semantics = [#tpu.dimension_semantics<parallel>], iteration_bounds = array<i64: 1>, scalar_prefetch = 0 : i64, scratch_operands = 0 : i64, tpu.core_type = #tpu.core_type<tc>, window_params = [{transform_indices = @transform_0, window_bounds = array<i64: 8, 8, 32>}, {transform_indices = @transform_1, window_bounds = array<i64: 8, 8>}, {pipeline_mode = #tpu.pipeline_mode<synchronous>, transform_indices = @transform_2, window_bounds = array<i64: 226, 64>}, {transform_indices = @transform_3, window_bounds = array<i64: 8, 32>}]} {
    %c0 = arith.constant 0 : index
    %c0_0 = arith.constant 0 : index
    %0 = vector.load %arg3[%c0, %c0_0] : memref<226x64xf32, #tpu.memory_space<vmem>>, vector<32x64xf32>
    %c32 = arith.constant 32 : index
    %c0_1 = arith.constant 0 : index
    %1 = vector.load %arg3[%c32, %c0_1] : memref<226x64xf32, #tpu.memory_space<vmem>>, vector<8x64xf32>
    %c40 = arith.constant 40 : index
    %c0_2 = arith.constant 0 : index
    %2 = vector.load %arg3[%c40, %c0_2] : memref<226x64xf32, #tpu.memory_space<vmem>>, vector<8x64xf32>
    %c48 = arith.constant 48 : index
    %c0_3 = arith.constant 0 : index
    %3 = vector.load %arg3[%c48, %c0_3] : memref<226x64xf32, #tpu.memory_space<vmem>>, vector<8x1xf32>
    %c56 = arith.constant 56 : index
    %c0_4 = arith.constant 0 : index
    %4 = vector.load %arg3[%c56, %c0_4] : memref<226x64xf32, #tpu.memory_space<vmem>>, vector<64x32xf32>
    %c120 = arith.constant 120 : index
    %c0_5 = arith.constant 0 : index
    %5 = vector.load %arg3[%c120, %c0_5] : memref<226x64xf32, #tpu.memory_space<vmem>>, vector<32x64xf32>
    %c152 = arith.constant 152 : index
    %c0_6 = arith.constant 0 : index
    %6 = vector.load %arg3[%c152, %c0_6] : memref<226x64xf32, #tpu.memory_space<vmem>>, vector<64x32xf32>
    %c216 = arith.constant 216 : index
    %c0_7 = arith.constant 0 : index
    %7 = vector.load %arg3[%c216, %c0_7] : memref<226x64xf32, #tpu.memory_space<vmem>>, vector<1x64xf32>
    %c217 = arith.constant 217 : index
    %c0_8 = arith.constant 0 : index
    %8 = vector.load %arg3[%c217, %c0_8] : memref<226x64xf32, #tpu.memory_space<vmem>>, vector<1x64xf32>
    %c218 = arith.constant 218 : index
    %c0_9 = arith.constant 0 : index
    %9 = vector.load %arg3[%c218, %c0_9] : memref<226x64xf32, #tpu.memory_space<vmem>>, vector<1x32xf32>
    %c219 = arith.constant 219 : index
    %c0_10 = arith.constant 0 : index
    %10 = vector.load %arg3[%c219, %c0_10] : memref<226x64xf32, #tpu.memory_space<vmem>>, vector<1x32xf32>
    %c220 = arith.constant 220 : index
    %c0_11 = arith.constant 0 : index
    %11 = vector.load %arg3[%c220, %c0_11] : memref<226x64xf32, #tpu.memory_space<vmem>>, vector<1x32xf32>
    %c221 = arith.constant 221 : index
    %c0_12 = arith.constant 0 : index
    %12 = vector.load %arg3[%c221, %c0_12] : memref<226x64xf32, #tpu.memory_space<vmem>>, vector<1x32xf32>
    %c222 = arith.constant 222 : index
    %c0_13 = arith.constant 0 : index
    %13 = vector.load %arg3[%c222, %c0_13] : memref<226x64xf32, #tpu.memory_space<vmem>>, vector<1x64xf32>
    %c223 = arith.constant 223 : index
    %c0_14 = arith.constant 0 : index
    %14 = vector.load %arg3[%c223, %c0_14] : memref<226x64xf32, #tpu.memory_space<vmem>>, vector<1x32xf32>
    %c224 = arith.constant 224 : index
    %c0_15 = arith.constant 0 : index
    %15 = vector.load %arg3[%c224, %c0_15] : memref<226x64xf32, #tpu.memory_space<vmem>>, vector<1x32xf32>
    %c225 = arith.constant 225 : index
    %c0_16 = arith.constant 0 : index
    %16 = vector.load %arg3[%c225, %c0_16] : memref<226x64xf32, #tpu.memory_space<vmem>>, vector<1x32xf32>
    %c0_17 = arith.constant 0 : index
    %c0_18 = arith.constant 0 : index
    %c0_19 = arith.constant 0 : index
    %17 = vector.load %arg1[%c0_17, %c0_18, %c0_19] : memref<8x8x32xf32, #tpu.memory_space<vmem>>, vector<8x8x32xf32>
    %18 = vector.shape_cast %17 : vector<8x8x32xf32> to vector<64x32xf32>
    %cst = arith.constant dense<0.000000e+00> : vector<64x64xf32>
    %19 = tpu.matmul %18, %0, %cst {dimension_numbers = #tpu.dot_dimension_numbers<[1], [0], [0], [1], [0, 0, 1, 1], [], []>} : vector<64x32xf32>, vector<32x64xf32>, vector<64x64xf32> -> vector<64x64xf32>
    %20 = vector.broadcast %7 : vector<1x64xf32> to vector<64x64xf32>
    %21 = arith.addf %19, %20 : vector<64x64xf32>
    %22 = vector.shape_cast %21 : vector<64x64xf32> to vector<8x8x64xf32>
    %23 = vector.shape_cast %1 : vector<8x64xf32> to vector<1x8x64xf32>
    %24 = vector.shape_cast %23 : vector<1x8x64xf32> to vector<1x8x64xf32>
    %25 = vector.broadcast %24 : vector<1x8x64xf32> to vector<8x8x64xf32>
    %cst_20 = arith.constant dense<0.000000e+00> : vector<8x8x8xf32>
    %26 = tpu.matmul %25, %22, %cst_20 {dimension_numbers = #tpu.dot_dimension_numbers<[2], [2], [1], [1], [0, 0, 0, 1, 1, 1], [0], [0]>} : vector<8x8x64xf32>, vector<8x8x64xf32>, vector<8x8x8xf32> -> vector<8x8x8xf32>
    %c0_21 = arith.constant 0 : index
    %c0_22 = arith.constant 0 : index
    %27 = vector.load %arg2[%c0_21, %c0_22] : memref<8x8xf32, #tpu.memory_space<vmem>>, vector<8x8xf32>
    %28 = vector.shape_cast %27 : vector<8x8xf32> to vector<8x1x8xf32>
    %29 = vector.broadcast %28 : vector<8x1x8xf32> to vector<8x8x8xf32>
    %30 = arith.addf %26, %29 : vector<8x8x8xf32>
    %31 = vector.shape_cast %3 : vector<8x1xf32> to vector<1x8x1xf32>
    %cst_23 = arith.constant dense<0xFF800000> : vector<8x8xf32>
    %32 = vector.multi_reduction <maximumf>, %30, %cst_23 [2] : vector<8x8x8xf32> to vector<8x8xf32>
    %33 = vector.shape_cast %32 : vector<8x8xf32> to vector<8x8x1xf32>
    %34 = vector.broadcast %31 : vector<1x8x1xf32> to vector<8x8x1xf32>
    %35 = arith.maximumf %33, %34 : vector<8x8x1xf32>
    %36 = vector.broadcast %35 : vector<8x8x1xf32> to vector<8x8x8xf32>
    %37 = arith.subf %30, %36 : vector<8x8x8xf32>
    %38 = math.exp %37 : vector<8x8x8xf32>
    %39 = vector.broadcast %31 : vector<1x8x1xf32> to vector<8x8x1xf32>
    %40 = arith.subf %39, %35 : vector<8x8x1xf32>
    %41 = math.exp %40 : vector<8x8x1xf32>
    %cst_24 = arith.constant dense<0.000000e+00> : vector<8x8xf32>
    %42 = vector.multi_reduction <add>, %38, %cst_24 [2] : vector<8x8x8xf32> to vector<8x8xf32>
    %43 = vector.shape_cast %42 : vector<8x8xf32> to vector<8x8x1xf32>
    %44 = arith.addf %43, %41 : vector<8x8x1xf32>
    %45 = vector.shape_cast %8 : vector<1x64xf32> to vector<1x1x64xf32>
    %46 = vector.broadcast %41 : vector<8x8x1xf32> to vector<8x8x64xf32>
    %47 = vector.broadcast %45 : vector<1x1x64xf32> to vector<8x8x64xf32>
    %48 = arith.mulf %46, %47 : vector<8x8x64xf32>
    %cst_25 = arith.constant dense<0.000000e+00> : vector<8x8x64xf32>
    %49 = tpu.matmul %38, %22, %cst_25 {dimension_numbers = #tpu.dot_dimension_numbers<[2], [1], [1], [2], [0, 0, 0, 1, 1, 2], [0], [0]>} : vector<8x8x8xf32>, vector<8x8x64xf32>, vector<8x8x64xf32> -> vector<8x8x64xf32>
    %50 = arith.addf %48, %49 : vector<8x8x64xf32>
    %51 = tpu.reciprocal %44 : vector<8x8x1xf32> -> vector<8x8x1xf32>
    %52 = vector.broadcast %51 : vector<8x8x1xf32> to vector<8x8x64xf32>
    %53 = arith.mulf %50, %52 : vector<8x8x64xf32>
    %54 = vector.shape_cast %2 : vector<8x64xf32> to vector<1x8x64xf32>
    %55 = vector.broadcast %54 : vector<1x8x64xf32> to vector<8x8x64xf32>
    %56 = arith.mulf %53, %55 : vector<8x8x64xf32>
    %cst_26 = arith.constant dense<0.000000e+00> : vector<8x64xf32>
    %57 = vector.multi_reduction <add>, %56, %cst_26 [1] : vector<8x8x64xf32> to vector<8x64xf32>
    %cst_27 = arith.constant dense<0.000000e+00> : vector<8x32xf32>
    %58 = tpu.matmul %57, %4, %cst_27 {dimension_numbers = #tpu.dot_dimension_numbers<[1], [0], [0], [1], [0, 0, 1, 1], [], []>} : vector<8x64xf32>, vector<64x32xf32>, vector<8x32xf32> -> vector<8x32xf32>
    %59 = vector.broadcast %10 : vector<1x32xf32> to vector<8x32xf32>
    %60 = arith.addf %58, %59 : vector<8x32xf32>
    %61 = vector.broadcast %9 : vector<1x32xf32> to vector<8x32xf32>
    %62 = arith.addf %61, %60 : vector<8x32xf32>
    %cst_28 = arith.constant dense<0.000000e+00> : vector<8xf32>
    %63 = vector.multi_reduction <add>, %62, %cst_28 [1] : vector<8x32xf32> to vector<8xf32>
    %64 = vector.shape_cast %63 : vector<8xf32> to vector<8x1xf32>
    %cst_29 = arith.constant 3.200000e+01 : f32
    %65 = vector.broadcast %cst_29 : f32 to vector<8x1xf32>
    %66 = arith.divf %64, %65 : vector<8x1xf32>
    %67 = vector.broadcast %66 : vector<8x1xf32> to vector<8x32xf32>
    %68 = arith.subf %62, %67 : vector<8x32xf32>
    %69 = arith.mulf %68, %68 : vector<8x32xf32>
    %cst_30 = arith.constant dense<0.000000e+00> : vector<8xf32>
    %70 = vector.multi_reduction <add>, %69, %cst_30 [1] : vector<8x32xf32> to vector<8xf32>
    %71 = vector.shape_cast %70 : vector<8xf32> to vector<8x1xf32>
    %cst_31 = arith.constant 3.200000e+01 : f32
    %72 = vector.broadcast %cst_31 : f32 to vector<8x1xf32>
    %73 = arith.divf %71, %72 : vector<8x1xf32>
    %74 = vector.broadcast %66 : vector<8x1xf32> to vector<8x32xf32>
    %75 = arith.subf %62, %74 : vector<8x32xf32>
    %cst_32 = arith.constant 9.99999974E-6 : f32
    %76 = vector.broadcast %cst_32 : f32 to vector<8x1xf32>
    %77 = arith.addf %73, %76 : vector<8x1xf32>
    %78 = math.rsqrt %77 : vector<8x1xf32>
    %79 = vector.broadcast %78 : vector<8x1xf32> to vector<8x32xf32>
    %80 = arith.mulf %75, %79 : vector<8x32xf32>
    %81 = vector.broadcast %11 : vector<1x32xf32> to vector<8x32xf32>
    %82 = arith.mulf %80, %81 : vector<8x32xf32>
    %83 = vector.broadcast %12 : vector<1x32xf32> to vector<8x32xf32>
    %84 = arith.addf %82, %83 : vector<8x32xf32>
    %cst_33 = arith.constant dense<0.000000e+00> : vector<8x64xf32>
    %85 = tpu.matmul %84, %5, %cst_33 {dimension_numbers = #tpu.dot_dimension_numbers<[1], [0], [0], [1], [0, 0, 1, 1], [], []>} : vector<8x32xf32>, vector<32x64xf32>, vector<8x64xf32> -> vector<8x64xf32>
    %86 = vector.broadcast %13 : vector<1x64xf32> to vector<8x64xf32>
    %87 = arith.addf %85, %86 : vector<8x64xf32>
    %cst_34 = arith.constant 0.000000e+00 : f32
    %88 = vector.broadcast %cst_34 : f32 to vector<8x64xf32>
    %89 = arith.maximumf %87, %88 : vector<8x64xf32>
    %cst_35 = arith.constant dense<0.000000e+00> : vector<8x32xf32>
    %90 = tpu.matmul %89, %6, %cst_35 {dimension_numbers = #tpu.dot_dimension_numbers<[1], [0], [0], [1], [0, 0, 1, 1], [], []>} : vector<8x64xf32>, vector<64x32xf32>, vector<8x32xf32> -> vector<8x32xf32>
    %91 = vector.broadcast %14 : vector<1x32xf32> to vector<8x32xf32>
    %92 = arith.addf %90, %91 : vector<8x32xf32>
    %93 = arith.addf %84, %92 : vector<8x32xf32>
    %cst_36 = arith.constant dense<0.000000e+00> : vector<8xf32>
    %94 = vector.multi_reduction <add>, %93, %cst_36 [1] : vector<8x32xf32> to vector<8xf32>
    %95 = vector.shape_cast %94 : vector<8xf32> to vector<8x1xf32>
    %cst_37 = arith.constant 3.200000e+01 : f32
    %96 = vector.broadcast %cst_37 : f32 to vector<8x1xf32>
    %97 = arith.divf %95, %96 : vector<8x1xf32>
    %98 = vector.broadcast %97 : vector<8x1xf32> to vector<8x32xf32>
    %99 = arith.subf %93, %98 : vector<8x32xf32>
    %100 = arith.mulf %99, %99 : vector<8x32xf32>
    %cst_38 = arith.constant dense<0.000000e+00> : vector<8xf32>
    %101 = vector.multi_reduction <add>, %100, %cst_38 [1] : vector<8x32xf32> to vector<8xf32>
    %102 = vector.shape_cast %101 : vector<8xf32> to vector<8x1xf32>
    %cst_39 = arith.constant 3.200000e+01 : f32
    %103 = vector.broadcast %cst_39 : f32 to vector<8x1xf32>
    %104 = arith.divf %102, %103 : vector<8x1xf32>
    %105 = vector.broadcast %97 : vector<8x1xf32> to vector<8x32xf32>
    %106 = arith.subf %93, %105 : vector<8x32xf32>
    %cst_40 = arith.constant 9.99999974E-6 : f32
    %107 = vector.broadcast %cst_40 : f32 to vector<8x1xf32>
    %108 = arith.addf %104, %107 : vector<8x1xf32>
    %109 = math.rsqrt %108 : vector<8x1xf32>
    %110 = vector.broadcast %109 : vector<8x1xf32> to vector<8x32xf32>
    %111 = arith.mulf %106, %110 : vector<8x32xf32>
    %112 = vector.broadcast %15 : vector<1x32xf32> to vector<8x32xf32>
    %113 = arith.mulf %111, %112 : vector<8x32xf32>
    %114 = vector.broadcast %16 : vector<1x32xf32> to vector<8x32xf32>
    %115 = arith.addf %113, %114 : vector<8x32xf32>
    %c0_41 = arith.constant 0 : index
    %c0_42 = arith.constant 0 : index
    %116 = vector.load %arg4[%c0_41, %c0_42] : memref<8x32xf32, #tpu.memory_space<vmem>>, vector<8x32xf32>
    tpu.vector_store %arg4[%c0_41, %c0_42], %115 {strides = array<i32>} : memref<8x32xf32, #tpu.memory_space<vmem>>, vector<8x32xf32>,
    return
  }
  func.func @transform_0(%arg0: i32) -> (i32, i32, i32) {
    %c0_i32 = arith.constant 0 : i32
    %c0_i32_0 = arith.constant 0 : i32
    %c0_i32_1 = arith.constant 0 : i32
    return %arg0, %c0_i32, %c0_i32_0 : i32, i32, i32
  }
  func.func @transform_1(%arg0: i32) -> (i32, i32) {
    %c0_i32 = arith.constant 0 : i32
    %c0_i32_0 = arith.constant 0 : i32
    return %arg0, %c0_i32 : i32, i32
  }
  func.func @transform_2(%arg0: i32) -> (i32, i32) {
    %c0_i32 = arith.constant 0 : i32
    %c0_i32_0 = arith.constant 0 : i32
    %c0_i32_1 = arith.constant 0 : i32
    return %c0_i32, %c0_i32_0 : i32, i32
  }
  func.func @transform_3(%arg0: i32) -> (i32, i32) {
    %c0_i32 = arith.constant 0 : i32
    %c0_i32_0 = arith.constant 0 : i32
    return %arg0, %c0_i32 : i32, i32
  }
}

</mosaic_0001>

<bundles_post_ra>
// kernel: tpu_custom_call.1
= control target key start
LH: loop header
LB: loop body
LE: loop exit
PB: predicated region body
PF: predicated region fallthrough
CT: control target
= control target key end

     0   :  { %vm64_vm0 = vcmask 261120   ;;  %s2962_s0 = inlined_call_operand.vmem [shape: f32[8,8,32], index: 0, kind: input, shape index: {}]   ;;  %s2963_s1 = inlined_call_operand.vmem [shape: f32[8,8], index: 1, kind: input, shape index: {}]   ;;  %s2964_s2 = inlined_call_operand.vmem [shape: f32[226,64], index: 2, kind: input, shape index: {}]   ;;  %s2965_s3 = inlined_call_operand.hbm [shape: f32[8,32], index: 3, kind: output, shape index: {}]  }
   0x1   :  { %v15_v0 = vld [vmem:[%s2964_s2] sm:$0xff]  ;;  %v16_v1 = vld [vmem:[%s2964_s2 + $0x8] sm:$0xff]  ;;  %v17_v2 = vld [vmem:[%s2964_s2 + $0x10] sm:$0xff] }
   0x2   :  { %v2372_v3 = vpack.c.bf16 %v16_v1, %v15_v0  ;;  %v18_v4 = vld [vmem:[%s2964_s2 + $0x18] sm:$0xff]  ;;  %v52_v5 = vld [vmem:[%s2962_s0] sm:$0xff]  ;;  %v58_v7 = vld [vmem:[%s2962_s0 + $0x30] sm:$0xff] }
   0x3   :  { %v2376_v6 = vpack.c.bf16 %v18_v4, %v17_v2  ;;  %2231 = vmatprep.mubr.msk.f32.mxu0 %vm64_vm0, %v52_v5 }
   0x4   :  { %2373 = vmatprep.subr.bf16.mxu0 %v2372_v3  ;;  %2410 = vmatprep.subr.bf16.mxu1 %v2372_v3 }
   0x5   :  { %2375 = vmatpush3.bf16.msra.mxu0 %v2372_v3  ;;  %2412 = vmatpush3.bf16.msra.mxu1 %v2372_v3 }
   0x6   :  { %8 = vsyncpa [#allocation3], 0  ;;  %2377 = vmatprep.subr.bf16.mxu0 %v2376_v6  ;;  %2411 = vmatprep.subr.bf16.mxu1 %v2376_v6  ;;  %v53_v8 = vld [vmem:[%s2962_s0 + $0x8] sm:$0xff]  ;;  %v59_v9 = vld [vmem:[%s2962_s0 + $0x38] sm:$0xff]  ;;  %v2499_v14 = vmov 0.0   ;;  %vm2500_vm1 = vmmov 0   ;;  %v200_v35 = vlaneseq }
   0x7   :  { %2240 = vmatprep.mubr.msk.f32.mxu1 %vm64_vm0, %v58_v7  ;;  %v54_v10 = vld [vmem:[%s2962_s0 + $0x10] sm:$0xff]  ;;  %v55_v11 = vld [vmem:[%s2962_s0 + $0x18] sm:$0xff]  ;;  %v56_v12 = vld [vmem:[%s2962_s0 + $0x20] sm:$0xff]  ;;  %vm285_vm2 = vcmask 523264   ;;  %v2501_v33 = vmov 1966171168  }
   0x8   :  { %v57_v13 = vld [vmem:[%s2962_s0 + $0x28] sm:$0xff]  ;;  %v2111_v15 = vld [vmem:[%s2964_s2 + $0xd8] ss:$0 sm:$0xff]  ;;  %v19_v22 = vld [vmem:[%s2964_s2 + $0x20] sm:$0xff]  ;;  %v198_v34 = vunpack.c.l.s4 %v2501_v33  ;;  %v201_v37 = vshrl.u32 %v200_v35, 7  ;;  %vm873_vm3 = vcmask 64512  }
   0x9   :  { %2379 = vmatpush3.bf16.msra.mxu0 %v2376_v6  ;;  %2413 = vmatpush3.bf16.msra.mxu1 %v2376_v6  ;;  %v194_v39 = vld [vmem:[%s2963_s1] sm:$0xff]  ;;  %vm1802_vm4 = vcmask 1041409   ;;  %vm1804_vm5 = vcmask 1042434   ;;  %vm1806_vm6 = vcmask 1043459   ;;  %vm1808_vm7 = vcmask 1044484   ;;  %s2504_s17 = smov [#allocation2]  }
   0xa   :  { %2243 = vmatprep.subr.mxu1 %v2499_v14  ;;  %2268 = vmatprep.subr.mxu0 %v2499_v14  ;;  %v199_v36 = vunpack.c.0.s8 %v198_v34  ;;  %v196_v41 = vcombine.high %v194_v39, %v194_v39  ;;  %v247_v43 = vsub.s32 0, %v201_v37  ;;  %vm1810_vm8 = vcmask 1045509   ;;  %s2103_s18 = sshll.u32 %s2504_s17, 4  ;;  %s2104_s18 = int_to_ptr.vmem [resolvable:$true] %s2103_s18 }
   0xb   :  { %vm1812_vm9 = vcmask 1046534   ;;  %vm1814_vm10 = vcmask 1047559   ;;  %s2475_s19 = scalar_lea.vmem %s2104_s18, 128  ;;  %p2480_p1 = scmp.lt.s32.totalorder %s2104_s18, %s2104_s18 }
   0xc   :  { %2232 = vmatmul.mubr.msk.f32.vlgmr.msra.gmra.mrb[0].mxu0 %vm64_vm0, %v53_v8  ;;  %2241 = vmatmul.mubr.msk.f32.vlgmr.msra.gmra.mrb[0].mxu1 %vm64_vm0, %v59_v9  ;;  %v202_v38 = vsub.s32 %v199_v36, %v201_v37  ;;  %p2476_p0 = scmp.ne.s32.totalorder %s2104_s18, %s2475_s19  ;;  %p2481_p2 = scmp.lt.s32.totalorder %s2475_s19, %s2475_s19 }
   0xd   :  { %2234 = vmatprep.mubr.msk.f32.mxu0 %vm64_vm0, %v54_v10  ;;  %2245 = vmatprep.mubr.msk.f32.mxu1 %vm2500_vm1, %v2499_v14 }
   0xe   :  { %v203_v40 = vrot.slane %v194_v39, %v202_v38  ;;  %v210_v47 = vrot.slane %v196_v41, %v202_v38  ;;  %p2482_p3 = por %p2481_p2, %p2480_p1 }
  0x10   :  { %2235 = vmatmul.mubr.msk.f32.gmra.mrb[2].mxu0 %vm64_vm0, %v55_v11  ;;  %v219_v42 = vrot.slane %v203_v40, %v202_v38  ;;  %v211_v44 = vcombine.high %v203_v40, %v203_v40  ;;  %v212_v53 = vcombine.high %v210_v47, %v210_v47  ;;  %v226_v1 = vrot.slane %v210_v47, %v202_v38  ;;  %p2483_p4 = pnand %p2482_p3, %p2476_p0 }
  0x11   :  { %2237 = vmatprep.mubr.msk.f32.mxu0 %vm64_vm0, %v56_v12 }
  0x12   :  { %v248_v45 = vrot.slane %v219_v42, %v247_v43  ;;  %v233_v46 = vrot.slane %v211_v44, %v202_v38  ;;  %v241_v52 = vcombine.high %v219_v42, %v219_v42  ;;  %v240_v60 = vrot.slane %v212_v53, %v202_v38  ;;  %v2679_v38 = vld [vmem:[%s2964_s2 + $0x30] sm:$0xff] }
  0x13   :  { %v264_v10 = vrot.slane %v226_v1, %v247_v43 }
  0x14   :  { %2238 = vmatmul.mubr.msk.f32.gmra.mrb[4].mxu0 %vm64_vm0, %v57_v13  ;;  %v252_v51 = vrot.slane %v233_v46, %v247_v43  ;;  %v256_v58 = vrot.slane %v241_v52, %v247_v43  ;;  %v243_v59 = vcombine.high %v233_v46, %v233_v46  ;;  %v268_v5 = vrot.slane %v240_v60, %v247_v43 }
  0x15   :  { %2270 = vmatprep.mubr.msk.f32.mxu0 %vm2500_vm1, %v2499_v14  ;;  %v244_v6 = vcombine.high %v240_v60, %v240_v60 }
  0x16   :  { %v260_v4 = vrot.slane %v243_v59, %v247_v43 }
  0xdf   :  { %v2233_v16 = vpop.f32.mrb[0].mxu0  ;;  %v2242_v17 = vpop.f32.mrb[0].mxu1 }
  0xe0   :  { %v155_v18 = vpop.f32.mrb[1].mxu0  ;;  %v185_v19 = vpop.f32.mrb[1].mxu1  ;;  %v161_v24 = vadd.f32 %v2233_v16, %v2111_v15  ;;  %v2595_v29 = vadd.f32 %v2242_v17, %v2111_v15  ;;  %v242_v16 = vcombine.high %v226_v1, %v226_v1  ;;  %v276_v17 = vrot.slane %v244_v6, %v247_v43 }
  0xe1   :  { %v156_v20 = vadd.f32 %v2111_v15, %v155_v18  ;;  %v2623_v32 = vadd.f32 %v2111_v15, %v185_v19 }
  0xe3   :  { %v2236_v21 = vpop.f32.mrb[2].mxu0  ;;  %2244 = vmatpush3.xpose.msk.msra.mxu1 %vm285_vm2, %v156_v20 }
  0xe4   :  { %v165_v23 = vpop.f32.mrb[3].mxu0  ;;  %2248 = vmatprep.subr.mxu1 %v2499_v14  ;;  %v2603_v30 = vadd.f32 %v2236_v21, %v2111_v15 }
  0xe5   :  { %v2584_v25 = vadd.f32 %v2111_v15, %v165_v23  ;;  %v272_v23 = vrot.slane %v242_v16, %v247_v43 }
  0xe6   :  { %2246 = vmatmul.mubr.msk.f32.vlgmr.msra.gmra.mrb[2].mxu1 %vm285_vm2, %v19_v22 }
  0xe7   :  { %v2239_v26 = vpop.f32.mrb[4].mxu0  ;;  %2249 = vmatpush3.xpose.msk.msra.mxu1 %vm285_vm2, %v161_v24  ;;  %2250 = vmatprep.mubr.msk.f32.mxu1 %vm2500_vm1, %v2499_v14 }
  0xe8   :  { %v2589_v27 = vadd.f32 %v2239_v26, %v2111_v15  ;;  %v175_v28 = vpop.f32.mrb[5].mxu0  ;;  %2253 = vmatprep.subr.mxu1 %v2499_v14 }
  0xe9   :  { %v2609_v31 = vadd.f32 %v2111_v15, %v175_v28  ;;  %v2502_v28 = vmov 0  }
  0xea   :  { %2251 = vmatmul.mubr.msk.f32.vlgmr.msra.gmra.mrb[4].mxu1 %vm285_vm2, %v19_v22  ;;  %2269 = vmatpush3.xpose.msk.msra.mxu0 %vm285_vm2, %v2589_v27 }
  0xeb   :  { %2254 = vmatpush3.xpose.msk.msra.mxu1 %vm285_vm2, %v2584_v25  ;;  %2255 = vmatprep.mubr.msk.f32.mxu1 %vm2500_vm1, %v2499_v14 }
  0xec   :  { %2278 = vmatprep.subr.mxu0 %v2499_v14  ;;  %2258 = vmatprep.subr.mxu1 %v2499_v14 }
  0xed   :  { %2271 = vmatmul.mubr.msk.f32.vlgmr.msra.gmra.mrb[6].mxu0 %vm285_vm2, %v19_v22  ;;  %2420 = vset.pattern.permute.xlu0 %v2502_v28 }
  0xee   :  { %2256 = vmatmul.mubr.msk.f32.vlgmr.msra.gmra.mrb[6].mxu1 %vm285_vm2, %v19_v22  ;;  %2279 = vmatpush3.xpose.msk.msra.mxu0 %vm285_vm2, %v2595_v29 }
  0xef   :  { %2259 = vmatpush3.xpose.msk.msra.mxu1 %vm285_vm2, %v2603_v30  ;;  %2260 = vmatprep.mubr.msk.f32.mxu1 %vm2500_vm1, %v2499_v14 }
  0xf0   :  { %2280 = vmatprep.mubr.msk.f32.mxu0 %vm2500_vm1, %v2499_v14  ;;  %2288 = vmatprep.subr.mxu0 %v2499_v14 }
  0xf1   :  { %2263 = vmatprep.subr.mxu1 %v2499_v14  ;;  %2281 = vmatmul.mubr.msk.f32.vlgmr.msra.gmra.mrb[8].mxu0 %vm285_vm2, %v19_v22 }
  0xf2   :  { %2261 = vmatmul.mubr.msk.f32.vlgmr.msra.gmra.mrb[8].mxu1 %vm285_vm2, %v19_v22  ;;  %2289 = vmatpush3.msra.mxu0 %v161_v24 }
  0xf3   :  { %2264 = vmatpush3.xpose.msk.msra.mxu1 %vm285_vm2, %v2609_v31  ;;  %2265 = vmatprep.mubr.msk.f32.mxu1 %vm2500_vm1, %v2499_v14 }
  0xf4   :  { %2273 = vmatprep.subr.mxu1 %v2499_v14  ;;  %2290 = vmatprep.mubr.msk.f32.mxu0 %vm2500_vm1, %v2499_v14 }
  0xf5   :  { %2298 = vmatprep.subr.mxu0 %v2499_v14  ;;  %2421 = vset.pattern.permute.xlu1 %v2502_v28 }
  0xf6   :  { %2266 = vmatmul.mubr.msk.f32.vlgmr.msra.gmra.mrb[10].mxu1 %vm285_vm2, %v19_v22 }
  0xf7   :  { %2274 = vmatpush3.xpose.msk.msra.mxu1 %vm285_vm2, %v2623_v32  ;;  %2275 = vmatprep.mubr.msk.f32.mxu1 %vm2500_vm1, %v2499_v14 }
  0xf8   :  { %2283 = vmatprep.subr.mxu1 %v2499_v14 }
  0xfa   :  { %2276 = vmatmul.mubr.msk.f32.vlgmr.msra.gmra.mrb[12].mxu1 %vm285_vm2, %v19_v22 }
  0xfb   :  { %2284 = vmatpush3.msra.mxu1 %v156_v20  ;;  %2285 = vmatprep.mubr.msk.f32.mxu1 %vm2500_vm1, %v2499_v14 }
  0xfc   :  { %2293 = vmatprep.subr.mxu1 %v2499_v14 }
 0x1b9   :  { %v358_v48 = vpop.f32.mrb[2].mxu1 }
 0x1ba   :  { %v2644_v49 = vadd.f32 %v358_v48, %v248_v45  ;;  %v2247_v50 = vpop.f32.mrb[3].mxu1 }
 0x1bc   :  { %v874_v54 = vsel %vm873_vm3, %v2644_v49, -inf }
 0x1bd   :  { %875 = vmax.xlane.f32.xlu0 %v874_v54  ;;  %v431_v55 = vpop.f32.mrb[4].mxu1 }
 0x1be   :  { %v2648_v56 = vadd.f32 %v431_v55, %v252_v51  ;;  %v2252_v57 = vpop.f32.mrb[5].mxu1 }
 0x1c0   :  { %v877_v61 = vsel %vm873_vm3, %v2648_v56, -inf  ;;  %v723_v62 = vpop.f32.mrb[6].mxu0 }
 0x1c1   :  { %878 = vmax.xlane.f32.xlu0 %v877_v61  ;;  %v504_v63 = vpop.f32.mrb[6].mxu1  ;;  %v2272_v0 = vpop.f32.mrb[7].mxu0  ;;  %v2658_v15 = vadd.f32 %v723_v62, %v268_v5 }
 0x1c2   :  { %v2652_v2 = vadd.f32 %v504_v63, %v256_v58  ;;  %v2257_v3 = vpop.f32.mrb[7].mxu1 }
 0x1c3   :  { %v889_v20 = vsel %vm873_vm3, %v2658_v15, -inf }
 0x1c4   :  { %v880_v7 = vsel %vm873_vm3, %v2652_v2, -inf  ;;  %v869_v8 = vpop.f32.mrb[8].mxu0 }
 0x1c5   :  { %881 = vmax.xlane.f32.xlu1 %v880_v7  ;;  %v577_v9 = vpop.f32.mrb[8].mxu1  ;;  %v2282_v11 = vpop.f32.mrb[9].mxu0  ;;  %v2666_v24 = vadd.f32 %v869_v8, %v276_v17 }
 0x1c6   :  { %v2656_v12 = vadd.f32 %v577_v9, %v260_v4  ;;  %v2262_v13 = vpop.f32.mrb[9].mxu1 }
 0x1c7   :  { %v895_v36 = vsel %vm873_vm3, %v2666_v24, -inf }
 0x1c8   :  { %v883_v18 = vsel %vm873_vm3, %v2656_v12, -inf }
 0x1c9   :  { %884 = vmax.xlane.f32.xlu1 %v883_v18  ;;  %v650_v19 = vpop.f32.mrb[10].mxu1 }
 0x1ca   :  { %v2664_v21 = vadd.f32 %v650_v19, %v264_v10  ;;  %v2267_v22 = vpop.f32.mrb[11].mxu1 }
 0x1cc   :  { %v886_v26 = vsel %vm873_vm3, %v2664_v21, -inf }
 0x1cd   :  { %890 = vmax.xlane.f32.xlu1 %v889_v20  ;;  %887 = vmax.xlane.f32.xlu0 %v886_v26  ;;  %v796_v33 = vpop.f32.mrb[12].mxu1 }
 0x1ce   :  { %v2670_v34 = vadd.f32 %v796_v33, %v272_v23  ;;  %v2277_v35 = vpop.f32.mrb[13].mxu1 }
 0x1d0   :  { %v892_v37 = vsel %vm873_vm3, %v2670_v34, -inf }
 0x1d1   :  { %893 = vmax.xlane.f32.xlu0 %v892_v37  ;;  %896 = vmax.xlane.f32.xlu1 %v895_v36 }
 0x24a   :  { %v876_v39 = vpop.xlane.xlu0 %875 }
 0x24b   :  { %v2682_v40 = vmax.f32 %v876_v39, %v2679_v38 }
 0x24d   :  { %v970_v41 = vsub.f32 %v2679_v38, %v2682_v40  ;;  %908 = vperm.xlu0 %2420, %v2682_v40  }
 0x24e   :  { %v879_v42 = vpop.xlane.xlu0 %878 }
 0x24f   :  { %v2688_v43 = vmax.f32 %v879_v42, %v2679_v38 }
 0x251   :  { %v971_v44 = vsub.f32 %v2679_v38, %v2688_v43  ;;  %913 = vperm.xlu1 %2421, %v2688_v43  }
 0x252   :  { %v882_v45 = vpop.xlane.xlu1 %881 }
 0x253   :  { %v2694_v46 = vmax.f32 %v882_v45, %v2679_v38 }
 0x255   :  { %v972_v47 = vsub.f32 %v2679_v38, %v2694_v46 }
 0x256   :  { %v885_v48 = vpop.xlane.xlu1 %884 }
 0x257   :  { %v2699_v50 = vmax.f32 %v885_v48, %v2679_v38  ;;  %v978_v48 = vmul.f32 1.442695, %v970_v41 }
 0x259   :  { %v973_v51 = vsub.f32 %v2679_v38, %v2699_v50 }
 0x25a   :  { %v891_v52 = vpop.xlane.xlu1 %890  ;;  %v888_v53 = vpop.xlane.xlu0 %887 }
 0x25b   :  { %v2704_v54 = vmax.f32 %v891_v52, %v2679_v38  ;;  %v2707_v55 = vmax.f32 %v888_v53, %v2679_v38  ;;  %v982_v52 = vmul.f32 1.442695, %v972_v47  ;;  %v984_v53 = vmul.f32 1.442695, %v973_v51 }
 0x25d   :  { %v975_v57 = vsub.f32 %v2679_v38, %v2704_v54  ;;  %933 = vperm.xlu1 %2421, %v2704_v54   ;;  %v974_v58 = vsub.f32 %v2679_v38, %v2707_v55 }
 0x25e   :  { %v894_v59 = vpop.xlane.xlu0 %893  ;;  %v897_v60 = vpop.xlane.xlu1 %896 }
 0x25f   :  { %v2715_v61 = vmax.f32 %v894_v59, %v2679_v38  ;;  %v2718_v62 = vmax.f32 %v897_v60, %v2679_v38  ;;  %v986_v43 = vmul.f32 1.442695, %v974_v58  ;;  %v988_v40 = vmul.f32 1.442695, %v975_v57 }
 0x261   :  { %918 = vperm.xlu1 %2421, %v2694_v46   ;;  %v976_v63 = vsub.f32 %v2679_v38, %v2715_v61  ;;  %v977_v0 = vsub.f32 %v2679_v38, %v2718_v62 }
 0x263   :  { %v990_v41 = vmul.f32 1.442695, %v976_v63  ;;  %v992_v47 = vmul.f32 1.442695, %v977_v0 }
 0x265   :  { %923 = vperm.xlu1 %2421, %v2699_v50  }
 0x269   :  { %928 = vperm.xlu1 %2421, %v2707_v55  }
 0x26d   :  { %938 = vperm.xlu1 %2421, %v2715_v61  }
 0x271   :  { %943 = vperm.xlu1 %2421, %v2718_v62  }
 0x2cc   :  { %v909_v1 = vpop.permute.xlu0 %908 }
 0x2cd   :  { %v946_v3 = vsub.f32 %v2644_v49, %v909_v1 }
 0x2cf   :  { %v954_v4 = vmul.f32 1.442695, %v946_v3 }
 0x2d0   :  { %v914_v5 = vpop.permute.xlu1 %913 }
 0x2d1   :  { %2423 = vpow2.f32 %v954_v4  ;;  %v947_v6 = vsub.f32 %v2648_v56, %v914_v5 }
 0x2d3   :  { %v956_v7 = vmul.f32 1.442695, %v947_v6 }
 0x2d5   :  { %2425 = vpow2.f32 %v956_v7 }
 0x2db   :  { %v2424_v8 = vpop.eup %2423 }
 0x2dc   :  { %v934_v9 = vpop.permute.xlu1 %933  ;;  %2286 = vmatmul.mubr.msk.f32.vlgmr.msra.gmra.mrb[14].mxu1 %vm873_vm3, %v2424_v8  ;;  %v994_v10 = vsel %vm873_vm3, %v2424_v8, 0.0 }
 0x2dd   :  { %v951_v11 = vsub.f32 %v2658_v15, %v934_v9  ;;  %2294 = vmatpush3.msra.mxu1 %v2584_v25  ;;  %995 = vadd.xlane.f32.xlu1 %v994_v10 }
 0x2de   :  { %2295 = vmatprep.mubr.msk.f32.mxu1 %vm2500_vm1, %v2499_v14  ;;  %2303 = vmatprep.subr.mxu1 %v2499_v14 }
 0x2df   :  { %v2426_v49 = vpop.eup %2425  ;;  %v964_v56 = vmul.f32 1.442695, %v951_v11 }
 0x2e0   :  { %2291 = vmatmul.mubr.msk.f32.vlgmr.msra.gmra.mrb[10].mxu0 %vm873_vm3, %v2426_v49  ;;  %v919_v13 = vpop.permute.xlu1 %918  ;;  %v997_v16 = vsel %vm873_vm3, %v2426_v49, 0.0 }
 0x2e1   :  { %2427 = vpow2.f32 %v964_v56  ;;  %2299 = vmatpush3.msra.mxu0 %v2603_v30  ;;  %v948_v15 = vsub.f32 %v2652_v2, %v919_v13  ;;  %998 = vadd.xlane.f32.xlu0 %v997_v16 }
 0x2e2   :  { %2300 = vmatprep.mubr.msk.f32.mxu0 %vm2500_vm1, %v2499_v14  ;;  %2308 = vmatprep.subr.mxu0 %v2499_v14 }
 0x2e3   :  { %v958_v25 = vmul.f32 1.442695, %v948_v15 }
 0x2e4   :  { %v924_v17 = vpop.permute.xlu1 %923 }
 0x2e5   :  { %2429 = vpow2.f32 %v958_v25  ;;  %v949_v18 = vsub.f32 %v2656_v12, %v924_v17 }
 0x2e7   :  { %v960_v19 = vmul.f32 1.442695, %v949_v18  ;;  %v22_v18 = vld [vmem:[%s2964_s2 + $0x38] sm:$0xff] }
 0x2e8   :  { %v929_v20 = vpop.permute.xlu1 %928 }
 0x2e9   :  { %2431 = vpow2.f32 %v960_v19  ;;  %v950_v22 = vsub.f32 %v2664_v21, %v929_v20  ;;  %v23_v19 = vld [vmem:[%s2964_s2 + $0x40] sm:$0xff] }
 0x2ea   :  { %v2381_v20 = vpack.c.bf16 %v23_v19, %v22_v18 }
 0x2eb   :  { %v2428_v23 = vpop.eup %2427  ;;  %v962_v30 = vmul.f32 1.442695, %v950_v22  ;;  %v2503_v22 = vmov 0.0|0.0  }
 0x2ec   :  { %v939_v26 = vpop.permute.xlu1 %938  ;;  %v1009_v2 = vsel %vm873_vm3, %v2428_v23, 0.0 }
 0x2ed   :  { %2433 = vpow2.f32 %v962_v30  ;;  %v952_v28 = vsub.f32 %v2670_v34, %v939_v26  ;;  %1010 = vadd.xlane.f32.xlu1 %v1009_v2  ;;  %v25_v30 = vld [vmem:[%s2964_s2 + $0x50] sm:$0xff]  ;;  %v26_v2 = vld [vmem:[%s2964_s2 + $0x58] sm:$0xff] }
 0x2ef   :  { %v2430_v33 = vpop.eup %2429  ;;  %v966_v35 = vmul.f32 1.442695, %v952_v28  ;;  %v27_v28 = vld [vmem:[%s2964_s2 + $0x60] sm:$0xff] }
 0x2f0   :  { %v944_v36 = vpop.permute.xlu1 %943  ;;  %2296 = vmatmul.mubr.msk.f32.vlgmr.msra.gmra.mrb[16].mxu1 %vm873_vm3, %v2430_v33  ;;  %v1000_v12 = vsel %vm873_vm3, %v2430_v33, 0.0  ;;  %v2387_v33 = vpack.c.bf16 %v27_v28, %v26_v2 }
 0x2f1   :  { %2435 = vpow2.f32 %v966_v35  ;;  %v953_v37 = vsub.f32 %v2666_v24, %v944_v36  ;;  %2304 = vmatpush3.msra.mxu1 %v2609_v31  ;;  %1001 = vadd.xlane.f32.xlu0 %v1000_v12  ;;  %v28_v35 = vld [vmem:[%s2964_s2 + $0x68] sm:$0xff]  ;;  %v29_v36 = vld [vmem:[%s2964_s2 + $0x70] sm:$0xff] }
 0x2f2   :  { %2305 = vmatprep.mubr.msk.f32.mxu1 %vm2500_vm1, %v2499_v14  ;;  %2313 = vmatprep.subr.mxu1 %v2499_v14  ;;  %v2390_v12 = vpack.c.bf16 %v29_v36, %v28_v35 }
 0x2f3   :  { %v2432_v21 = vpop.eup %2431  ;;  %v968_v34 = vmul.f32 1.442695, %v953_v37 }
 0x2f4   :  { %2301 = vmatmul.mubr.msk.f32.vlgmr.msra.gmra.mrb[12].mxu0 %vm873_vm3, %v2432_v21  ;;  %v1003_v39 = vsel %vm873_vm3, %v2432_v21, 0.0 }
 0x2f5   :  { %2437 = vpow2.f32 %v968_v34  ;;  %2309 = vmatpush3.msra.mxu0 %v2589_v27  ;;  %1004 = vadd.xlane.f32.xlu1 %v1003_v39 }
 0x2f6   :  { %2310 = vmatprep.mubr.msk.f32.mxu0 %vm2500_vm1, %v2499_v14  ;;  %2318 = vmatprep.subr.mxu0 %v2499_v14 }
 0x2f7   :  { %v2434_v31 = vpop.eup %2433 }
 0x2f8   :  { %2306 = vmatmul.mubr.msk.f32.vlgmr.msra.gmra.mrb[18].mxu1 %vm873_vm3, %v2434_v31  ;;  %2311 = vmatmul.mubr.msk.f32.vlgmr.msra.gmra.mrb[14].mxu0 %vm873_vm3, %v2428_v23  ;;  %v1006_v24 = vsel %vm873_vm3, %v2434_v31, 0.0  ;;  %v24_v23 = vld [vmem:[%s2964_s2 + $0x48] sm:$0xff] }
 0x2f9   :  { %2314 = vmatpush3.msra.mxu1 %v2623_v32  ;;  %2319 = vmatpush3.msra.mxu0 %v2595_v29  ;;  %v980_v32 = vmul.f32 1.442695, %v971_v44  ;;  %v2384_v26 = vpack.c.bf16 %v25_v30, %v24_v23 }
 0x2fa   :  { %1007 = vadd.xlane.f32.xlu0 %v1006_v24  ;;  %2315 = vmatprep.mubr.msk.f32.mxu1 %vm2500_vm1, %v2499_v14 }
 0x2fb   :  { %v2436_v27 = vpop.eup %2435  ;;  %2320 = vmatprep.mubr.msk.f32.mxu0 %vm2500_vm1, %v2499_v14  ;;  %2439 = vpow2.f32 %v980_v32  ;;  %2380 = vmatprep.subr.bf16.mxu1 %v2503_v22 }
 0x2fc   :  { %2316 = vmatmul.mubr.msk.f32.vlgmr.msra.gmra.mrb[20].mxu1 %vm873_vm3, %v2436_v27  ;;  %v1012_v42 = vsel %vm873_vm3, %v2436_v27, 0.0  ;;  %2441 = vpow2.f32 %v978_v48  ;;  %2392 = vmatprep.subr.bf16.mxu0 %v2503_v22 }
 0x2fd   :  { %2339 = vmatprep.mubr.msk.f32.mxu1 %vm2500_vm1, %v2499_v14  ;;  %2443 = vpow2.f32 %v982_v52  ;;  %2382 = vmatpush3.bf16.msra.mxu1 %v2381_v20 }
 0x2fe   :  { %1013 = vadd.xlane.f32.xlu0 %v1012_v42  ;;  %2445 = vpow2.f32 %v984_v53  ;;  %2383 = vmatprep.subr.bf16.mxu1 %v2503_v22 }
 0x2ff   :  { %v2438_v45 = vpop.eup %2437  ;;  %2447 = vpow2.f32 %v986_v43 }
 0x300   :  { %2321 = vmatmul.mubr.msk.f32.vlgmr.msra.gmra.mrb[16].mxu0 %vm873_vm3, %v2438_v45  ;;  %v1015_v29 = vsel %vm873_vm3, %v2438_v45, 0.0  ;;  %2449 = vpow2.f32 %v988_v40 }
 0x301   :  { %1016 = vadd.xlane.f32.xlu1 %v1015_v29  ;;  %2350 = vmatprep.mubr.msk.f32.mxu0 %vm2500_vm1, %v2499_v14  ;;  %2451 = vpow2.f32 %v990_v41 }
 0x302   :  { %2453 = vpow2.f32 %v992_v47  ;;  %2385 = vmatpush3.bf16.msra.mxu1 %v2384_v26 }
 0x303   :  { %2386 = vmatprep.subr.bf16.mxu1 %v2503_v22 }
 0x305   :  { %v2440_v44 = vpop.eup %2439 }
 0x306   :  { %v2442_v46 = vpop.eup %2441  ;;  %2388 = vmatpush3.bf16.msra.mxu1 %v2387_v33 }
 0x307   :  { %v2444_v50 = vpop.eup %2443  ;;  %2389 = vmatprep.subr.bf16.mxu1 %v2503_v22 }
 0x308   :  { %v2446_v51 = vpop.eup %2445 }
 0x309   :  { %v2448_v54 = vpop.eup %2447 }
 0x30a   :  { %v2450_v55 = vpop.eup %2449  ;;  %2391 = vmatpush3.bf16.msra.mxu1 %v2390_v12 }
 0x30b   :  { %v2452_v57 = vpop.eup %2451 }
 0x30c   :  { %v2454_v58 = vpop.eup %2453 }
 0x312   :  { %1033 = vperm.xlu1 %2421, %v2440_v44  }
 0x314   :  { %1028 = vperm.xlu0 %2420, %v2442_v46  }
 0x316   :  { %1038 = vperm.xlu1 %2421, %v2444_v50  }
 0x318   :  { %1043 = vperm.xlu0 %2420, %v2446_v51  }
 0x31a   :  { %1048 = vperm.xlu1 %2421, %v2448_v54  }
 0x31c   :  { %1053 = vperm.xlu0 %2420, %v2450_v55  }
 0x31e   :  { %1058 = vperm.xlu1 %2421, %v2452_v57  }
 0x322   :  { %1063 = vperm.xlu1 %2421, %v2454_v58  }
 0x36a   :  { %v996_v59 = vpop.xlane.xlu1 %995 }
 0x36b   :  { %v1018_v60 = vadd.f32 %v2442_v46, %v996_v59 }
 0x36d   :  { %2455 = vrcp.f32 %v1018_v60  ;;  %v2847_v60 = vld [vmem:[%s2964_s2 + $0x28] sm:$0xff] }
 0x36e   :  { %v999_v61 = vpop.xlane.xlu0 %998 }
 0x36f   :  { %v1019_v38 = vadd.f32 %v2440_v44, %v999_v61 }
 0x371   :  { %2457 = vrcp.f32 %v1019_v38 }
 0x377   :  { %v2456_v62 = vpop.eup %2455 }
 0x378   :  { %1680 = vperm.xlu1 %2421, %v2456_v62  }
 0x37a   :  { %v1011_v63 = vpop.xlane.xlu1 %1010 }
 0x37b   :  { %v2458_v0 = vpop.eup %2457  ;;  %v1023_v1 = vadd.f32 %v2450_v55, %v1011_v63 }
 0x37c   :  { %1685 = vperm.xlu0 %2420, %v2458_v0  }
 0x37d   :  { %2459 = vrcp.f32 %v1023_v1 }
 0x37e   :  { %v1002_v3 = vpop.xlane.xlu0 %1001 }
 0x37f   :  { %v1020_v4 = vadd.f32 %v2444_v50, %v1002_v3 }
 0x381   :  { %2461 = vrcp.f32 %v1020_v4 }
 0x382   :  { %v1005_v5 = vpop.xlane.xlu1 %1004 }
 0x383   :  { %v1021_v6 = vadd.f32 %v2446_v51, %v1005_v5  ;;  %v2841_v51 = vld [vmem:[%s2964_s2 + $0xd9] ss:$0 sm:$0xff] }
 0x385   :  { %2463 = vrcp.f32 %v1021_v6 }
 0x387   :  { %v2460_v7 = vpop.eup %2459  ;;  %v1008_v8 = vpop.xlane.xlu0 %1007 }
 0x388   :  { %v1022_v9 = vadd.f32 %v2448_v54, %v1008_v8  ;;  %1705 = vperm.xlu0 %2420, %v2460_v7  }
 0x38a   :  { %2465 = vrcp.f32 %v1022_v9 }
 0x38b   :  { %v2462_v10 = vpop.eup %2461  ;;  %v1014_v11 = vpop.xlane.xlu0 %1013 }
 0x38c   :  { %v1024_v49 = vadd.f32 %v2452_v57, %v1014_v11  ;;  %1690 = vperm.xlu0 %2420, %v2462_v10  }
 0x38e   :  { %2467 = vrcp.f32 %v1024_v49  ;;  %v1017_v56 = vpop.xlane.xlu1 %1016 }
 0x38f   :  { %v2464_v13 = vpop.eup %2463  ;;  %v1025_v16 = vadd.f32 %v2454_v58, %v1017_v56 }
 0x390   :  { %1695 = vperm.xlu0 %2420, %v2464_v13  }
 0x391   :  { %2469 = vrcp.f32 %v1025_v16 }
 0x392   :  { %v1034_v41 = vpop.permute.xlu1 %1033 }
 0x393   :  { %v1029_v47 = vpop.permute.xlu0 %1028  ;;  %v1071_v38 = vmul.f32 %v2841_v51, %v1034_v41 }
 0x394   :  { %v2466_v15 = vpop.eup %2465  ;;  %v1070_v57 = vmul.f32 %v2841_v51, %v1029_v47 }
 0x395   :  { %1700 = vperm.xlu1 %2421, %v2466_v15  }
 0x396   :  { %v1039_v44 = vpop.permute.xlu1 %1038 }
 0x397   :  { %v1044_v54 = vpop.permute.xlu0 %1043  ;;  %v1072_v18 = vmul.f32 %v2841_v51, %v1039_v44 }
 0x398   :  { %v2468_v25 = vpop.eup %2467  ;;  %v1073_v33 = vmul.f32 %v2841_v51, %v1044_v54 }
 0x399   :  { %1710 = vperm.xlu1 %2421, %v2468_v25  }
 0x39a   :  { %v1049_v46 = vpop.permute.xlu1 %1048 }
 0x39b   :  { %v2470_v17 = vpop.eup %2469  ;;  %v1054_v59 = vpop.permute.xlu0 %1053 }
 0x39c   :  { %1715 = vperm.xlu0 %2420, %v2470_v17   ;;  %v1075_v56 = vmul.f32 %v2841_v51, %v1054_v59 }
 0x39e   :  { %v1059_v50 = vpop.permute.xlu1 %1058 }
 0x3a2   :  { %v1064_v55 = vpop.permute.xlu1 %1063 }
 0x3af   :  { %v1147_v37 = vpop.f32.mrb[14].mxu1 }
 0x3b0   :  { %v2287_v21 = vpop.f32.mrb[15].mxu1  ;;  %v1662_v58 = vadd.f32 %v1147_v37, %v1070_v57 }
 0x3b3   :  { %v1220_v34 = vpop.f32.mrb[10].mxu0 }
 0x3b4   :  { %v2292_v39 = vpop.f32.mrb[11].mxu0  ;;  %v1663_v63 = vadd.f32 %v1220_v34, %v1071_v38  ;;  %v1077_v38 = vmul.f32 %v2841_v51, %v1064_v55 }
 0x3c3   :  { %v1293_v31 = vpop.f32.mrb[16].mxu1 }
 0x3c4   :  { %v2297_v24 = vpop.f32.mrb[17].mxu1  ;;  %v1664_v23 = vadd.f32 %v1293_v31, %v1072_v18 }
 0x3c7   :  { %v1366_v27 = vpop.f32.mrb[12].mxu0 }
 0x3c8   :  { %v2302_v42 = vpop.f32.mrb[13].mxu0  ;;  %v1665_v37 = vadd.f32 %v1366_v27, %v1073_v33  ;;  %v1076_v27 = vmul.f32 %v2841_v51, %v1059_v50 }
 0x3c9   :  { %v1074_v42 = vmul.f32 %v2841_v51, %v1049_v46 }
 0x3cb   :  { %v2832_v45 = vpop.f32.mrb[18].mxu1  ;;  %v1512_v29 = vpop.f32.mrb[14].mxu0 }
 0x3cc   :  { %v2307_v32 = vpop.f32.mrb[19].mxu1  ;;  %v2312_v48 = vpop.f32.mrb[15].mxu0  ;;  %v1667_v16 = vadd.f32 %v1512_v29, %v1075_v56 }
 0x3cd   :  { %v1666_v48 = vadd.f32 %v2832_v45, %v1074_v42 }
 0x3cf   :  { %v2834_v52 = vpop.f32.mrb[20].mxu1 }
 0x3d0   :  { %v2317_v53 = vpop.f32.mrb[21].mxu1 }
 0x3d3   :  { %v2836_v43 = vpop.f32.mrb[16].mxu0 }
 0x3d4   :  { %v2322_v40 = vpop.f32.mrb[17].mxu0  ;;  %v1669_v50 = vadd.f32 %v2836_v43, %v1077_v38 }
 0x3f7   :  { %v1681_v61 = vpop.permute.xlu1 %1680 }
 0x3f8   :  { %v1718_v62 = vmul.f32 %v1681_v61, %v1662_v58  ;;  %v1668_v58 = vadd.f32 %v2834_v52, %v1076_v27 }
 0x3fa   :  { %v1726_v0 = vmul.f32 %v1718_v62, %v2847_v60 }
 0x3fb   :  { %v1686_v1 = vpop.permute.xlu0 %1685 }
 0x3fc   :  { %v1734_v3 = vsel %vm285_vm2, %v1726_v0, 0.0  ;;  %v1719_v4 = vmul.f32 %v1686_v1, %v1663_v63 }
 0x3fd   :  { %v1735_v5 = vrot.slane %v1734_v3, 4 }
 0x3fe   :  { %v1727_v6 = vmul.f32 %v1719_v4, %v2847_v60 }
 0x3ff   :  { %v1736_v7 = vadd.f32 %v1735_v5, %v1734_v3 }
 0x400   :  { %v1741_v8 = vsel %vm285_vm2, %v1727_v6, 0.0 }
 0x401   :  { %v1737_v9 = vrot.slane %v1736_v7, 2  ;;  %v1742_v10 = vrot.slane %v1741_v8, 4 }
 0x403   :  { %v1738_v11 = vadd.f32 %v1737_v9, %v1736_v7  ;;  %v1743_v49 = vadd.f32 %v1742_v10, %v1741_v8 }
 0x405   :  { %v1744_v13 = vrot.slane %v1743_v49, 2  ;;  %v1739_v15 = vrot.slane %v1738_v11, 1 }
 0x407   :  { %v1745_v25 = vadd.f32 %v1744_v13, %v1743_v49  ;;  %v1706_v17 = vpop.permute.xlu0 %1705  ;;  %v1740_v26 = vadd.f32 %v1739_v15, %v1738_v11 }
 0x408   :  { %v1723_v19 = vmul.f32 %v1706_v17, %v1667_v16 }
 0x409   :  { %v1746_v20 = vrot.slane %v1745_v25, 1 }
 0x40a   :  { %v1731_v30 = vmul.f32 %v1723_v19, %v2847_v60 }
 0x40b   :  { %v1747_v2 = vadd.f32 %v1746_v20, %v1745_v25  ;;  %v1691_v28 = vpop.permute.xlu0 %1690 }
 0x40c   :  { %v1720_v35 = vmul.f32 %v1691_v28, %v1664_v23  ;;  %v1769_v12 = vsel %vm285_vm2, %v1731_v30, 0.0 }
 0x40d   :  { %v1803_v36 = vsel %vm1802_vm4, %v1747_v2, %v1740_v26  ;;  %v1770_v39 = vrot.slane %v1769_v12, 4 }
 0x40e   :  { %v1728_v21 = vmul.f32 %v1720_v35, %v2847_v60 }
 0x40f   :  { %v1696_v34 = vpop.permute.xlu0 %1695  ;;  %v1771_v40 = vadd.f32 %v1770_v39, %v1769_v12 }
 0x410   :  { %v1748_v24 = vsel %vm285_vm2, %v1728_v21, 0.0  ;;  %v1721_v31 = vmul.f32 %v1696_v34, %v1665_v37 }
 0x411   :  { %v1749_v29 = vrot.slane %v1748_v24, 4  ;;  %v1772_v62 = vrot.slane %v1771_v40, 2 }
 0x412   :  { %v1729_v32 = vmul.f32 %v1721_v31, %v2847_v60  ;;  %v2145_v31 = vld [vmem:[%s2964_s2 + $0xdb] ss:$0 sm:$0xff] }
 0x413   :  { %v1750_v53 = vadd.f32 %v1749_v29, %v1748_v24  ;;  %v1773_v10 = vadd.f32 %v1772_v62, %v1771_v40  ;;  %v2147_v29 = vld [vmem:[%s2964_s2 + $0xda] ss:$0 sm:$0xff] }
 0x414   :  { %v1755_v41 = vsel %vm285_vm2, %v1729_v32, 0.0  ;;  %v1701_v44 = vpop.permute.xlu1 %1700 }
 0x415   :  { %v1751_v47 = vrot.slane %v1750_v53, 2  ;;  %v1756_v54 = vrot.slane %v1755_v41, 4  ;;  %v1722_v57 = vmul.f32 %v1701_v44, %v1666_v48  ;;  %v1774_v17 = vrot.slane %v1773_v10, 1 }
 0x417   :  { %v1752_v59 = vadd.f32 %v1751_v47, %v1750_v53  ;;  %v1757_v61 = vadd.f32 %v1756_v54, %v1755_v41  ;;  %v1730_v46 = vmul.f32 %v1722_v57, %v2847_v60  ;;  %v1775_v28 = vadd.f32 %v1774_v17, %v1773_v10  ;;  %v30_v57 = vld [vmem:[%s2964_s2 + $0x78] sm:$0xff] }
 0x418   :  { %v1711_v45 = vpop.permute.xlu1 %1710 }
 0x419   :  { %v1753_v63 = vrot.slane %v1752_v59, 1  ;;  %v1758_v0 = vrot.slane %v1757_v61, 2  ;;  %v1762_v1 = vsel %vm285_vm2, %v1730_v46, 0.0  ;;  %v1724_v3 = vmul.f32 %v1711_v45, %v1668_v58  ;;  %v31_v58 = vld [vmem:[%s2964_s2 + $0x80] sm:$0xff]  ;;  %v33_v46 = vld [vmem:[%s2964_s2 + $0x90] sm:$0xff] }
 0x41a   :  { %v1763_v4 = vrot.slane %v1762_v1, 4 }
 0x41b   :  { %v1754_v5 = vadd.f32 %v1753_v63, %v1752_v59  ;;  %v1759_v6 = vadd.f32 %v1758_v0, %v1757_v61  ;;  %v1732_v52 = vmul.f32 %v1724_v3, %v2847_v60  ;;  %v1716_v7 = vpop.permute.xlu0 %1715  ;;  %v2393_v59 = vpack.c.bf16 %v31_v58, %v30_v57  ;;  %v32_v61 = vld [vmem:[%s2964_s2 + $0x88] sm:$0xff] }
 0x41c   :  { %v1764_v8 = vadd.f32 %v1763_v4, %v1762_v1  ;;  %v1725_v9 = vmul.f32 %v1716_v7, %v1669_v50  ;;  %v2396_v38 = vpack.c.bf16 %v33_v46, %v32_v61  ;;  %v2148_v1 = vld [vmem:[%s2964_s2 + $0xdc] ss:$0 sm:$0xff]  ;;  %v35_v4 = vld [vmem:[%s2964_s2 + $0xa0] sm:$0xff] }
 0x41d   :  { %v1805_v51 = vsel %vm1804_vm5, %v1754_v5, %v1803_v36  ;;  %v1760_v55 = vrot.slane %v1759_v6, 1  ;;  %v1776_v11 = vsel %vm285_vm2, %v1732_v52, 0.0  ;;  %2394 = vmatpush3.bf16.msra.mxu0 %v2393_v59  ;;  %v34_v50 = vld [vmem:[%s2964_s2 + $0x98] sm:$0xff] }
 0x41e   :  { %v1765_v49 = vrot.slane %v1764_v8, 2  ;;  %v1777_v56 = vrot.slane %v1776_v11, 4  ;;  %v1733_v13 = vmul.f32 %v1725_v9, %v2847_v60  ;;  %2395 = vmatprep.subr.bf16.mxu0 %v2503_v22  ;;  %v2149_v5 = vld [vmem:[%s2964_s2 + $0xdd] ss:$0 sm:$0xff]  ;;  %v2399_v52 = vpack.c.bf16 %v35_v4, %v34_v50  ;;  %v37_v9 = vld [vmem:[%s2964_s2 + $0xb0] sm:$0xff] }
 0x41f   :  { %v1761_v43 = vadd.f32 %v1760_v55, %v1759_v6  ;;  %v39_v55 = vld [vmem:[%s2964_s2 + $0xc0] sm:$0xff] }
 0x420   :  { %v1766_v16 = vadd.f32 %v1765_v49, %v1764_v8  ;;  %v1778_v15 = vadd.f32 %v1777_v56, %v1776_v11  ;;  %v1783_v25 = vsel %vm285_vm2, %v1733_v13, 0.0  ;;  %v36_v8 = vld [vmem:[%s2964_s2 + $0xa8] sm:$0xff]  ;;  %v41_v49 = vld [vmem:[%s2964_s2 + $0xd0] sm:$0xff]  ;;  %v2150_v13 = vld [vmem:[%s2964_s2 + $0xde] ss:$0 sm:$0xff] }
 0x421   :  { %v1807_v18 = vsel %vm1806_vm6, %v1761_v43, %v1805_v51  ;;  %v1784_v19 = vrot.slane %v1783_v25, 4  ;;  %2397 = vmatpush3.bf16.msra.mxu0 %v2396_v38  ;;  %v2402_v10 = vpack.c.bf16 %v37_v9, %v36_v8  ;;  %v38_v51 = vld [vmem:[%s2964_s2 + $0xb8] sm:$0xff] }
 0x422   :  { %v1767_v20 = vrot.slane %v1766_v16, 1  ;;  %v1779_v23 = vrot.slane %v1778_v15, 2  ;;  %2398 = vmatprep.subr.bf16.mxu0 %v2503_v22  ;;  %v2405_v11 = vpack.c.bf16 %v39_v55, %v38_v51 }
 0x423   :  { %v1785_v30 = vadd.f32 %v1784_v19, %v1783_v25 }
 0x424   :  { %v1768_v26 = vadd.f32 %v1767_v20, %v1766_v16  ;;  %v1780_v2 = vadd.f32 %v1779_v23, %v1778_v15 }
 0x425   :  { %v1786_v33 = vrot.slane %v1785_v30, 2 }
 0x426   :  { %v1781_v35 = vrot.slane %v1780_v2, 1  ;;  %v1809_v36 = vsel %vm1808_vm7, %v1768_v26, %v1807_v18 }
 0x427   :  { %v1787_v60 = vadd.f32 %v1786_v33, %v1785_v30  ;;  %v1811_v12 = vsel %vm1810_vm8, %v1775_v28, %v1809_v36 }
 0x428   :  { %v1782_v37 = vadd.f32 %v1781_v35, %v1780_v2 }
 0x429   :  { %v1788_v21 = vrot.slane %v1787_v60, 1 }
 0x42a   :  { %v1813_v34 = vsel %vm1812_vm9, %v1782_v37, %v1811_v12  ;;  %v2154_v37 = vld [vmem:[%s2964_s2 + $0xe0] ss:$0 sm:$0xff] }
 0x42b   :  { %v1789_v39 = vadd.f32 %v1788_v21, %v1787_v60 }
 0x42d   :  { %v1815_v24 = vsel %vm1814_vm10, %v1789_v39, %v1813_v34  ;;  %v2155_v34 = vld [vmem:[%s2964_s2 + $0xe1] ss:$0 sm:$0xff] }
 0x42e   :  { %2340 = vmatmul.mubr.msk.f32.vlgmr.msra.gmra.mrb[22].mxu1 %vm285_vm2, %v1815_v24 }
 0x501   :  { %v1884_v42 = vpop.f32.mrb[22].mxu1 }
 0x502   :  { %v1885_v32 = vadd.f32 %v2145_v31, %v1884_v42  ;;  %v2341_v48 = vpop.f32.mrb[23].mxu1 }
 0x504   :  { %v1892_v53 = vadd.f32 %v2147_v29, %v1885_v32 }
 0x506   :  { %v1893_v40 = vsel %vm64_vm0, %v1892_v53, 0.0 }
 0x507   :  { %1894 = vadd.xlane.f32.xlu1 %v1893_v40 }
 0x594   :  { %v1895_v41 = vpop.xlane.xlu1 %1894 }
 0x595   :  { %v1897_v44 = vmul.f32 0.03125, %v1895_v41 }
 0x597   :  { %v1898_v27 = vsub.f32 %v1892_v53, %v1897_v44 }
 0x599   :  { %v1899_v47 = vmul.f32 %v1898_v27, %v1898_v27 }
 0x59b   :  { %v1900_v54 = vsel %vm64_vm0, %v1899_v47, 0.0 }
 0x59c   :  { %1901 = vadd.xlane.f32.xlu0 %v1900_v54 }
 0x629   :  { %v1902_v62 = vpop.xlane.xlu0 %1901 }
 0x62a   :  { %v1903_v45 = vmul.f32 0.03125, %v1902_v62 }
 0x62c   :  { %v1904_v63 = vadd.f32 1e-05, %v1903_v45 }
 0x62e   :  { %2471 = vrsqrt.f32 %v1904_v63 }
 0x638   :  { %v2472_v0 = vpop.eup %2471 }
 0x639   :  { %v1906_v3 = vmul.f32 %v2472_v0, %v1898_v27 }
 0x63b   :  { %v1911_v6 = vmul.f32 %v2148_v1, %v1906_v3 }
 0x63d   :  { %v1916_v7 = vadd.f32 %v2149_v5, %v1911_v6 }
 0x63f   :  { %2351 = vmatmul.mubr.msk.f32.vlgmr.msra.gmra.mrb[18].mxu0 %vm64_vm0, %v1916_v7 }
 0x640   :  { %2400 = vmatpush3.bf16.msra.mxu0 %v2399_v52  ;;  %2369 = vmatprep.mubr.msk.f32.mxu0 %vm2500_vm1, %v2499_v14  ;;  %v40_v14 = vld [vmem:[%s2964_s2 + $0xc8] sm:$0xff] }
 0x641   :  { %2401 = vmatprep.subr.bf16.mxu0 %v2503_v22  ;;  %v2408_v56 = vpack.c.bf16 %v41_v49, %v40_v14 }
 0x644   :  { %2403 = vmatpush3.bf16.msra.mxu0 %v2402_v10 }
 0x645   :  { %2404 = vmatprep.subr.bf16.mxu0 %v2503_v22 }
 0x648   :  { %2406 = vmatpush3.bf16.msra.mxu0 %v2405_v11 }
 0x649   :  { %2407 = vmatprep.subr.bf16.mxu0 %v2503_v22  ;;  %v2152_v22 = vld [vmem:[%s2964_s2 + $0xdf] ss:$0 sm:$0xff] }
 0x64c   :  { %2409 = vmatpush3.bf16.msra.mxu0 %v2408_v56 }
 0x712   :  { %v1990_v43 = vpop.f32.mrb[18].mxu0 }
 0x713   :  { %v1991_v16 = vadd.f32 %v2150_v13, %v1990_v43  ;;  %v2352_v15 = vpop.f32.mrb[19].mxu0 }
 0x715   :  { %v1994_v25 = vmax.f32 %v1991_v16, 0.0 }
 0x717   :  { %2370 = vmatmul.mubr.msk.f32.vlgmr.msra.gmra.mrb[20].mxu0 %vm285_vm2, %v1994_v25 }
 0x7ea   :  { %v2068_v17 = vpop.f32.mrb[20].mxu0 }
 0x7eb   :  { %v2069_v18 = vadd.f32 %v2152_v22, %v2068_v17  ;;  %v2371_v19 = vpop.f32.mrb[21].mxu0 }
 0x7ed   :  { %v2072_v20 = vadd.f32 %v2069_v18, %v1916_v7 }
 0x7ef   :  { %v2073_v23 = vsel %vm64_vm0, %v2072_v20, 0.0 }
 0x7f0   :  { %2074 = vadd.xlane.f32.xlu0 %v2073_v23 }
 0x87d   :  { %v2075_v30 = vpop.xlane.xlu0 %2074 }
 0x87e   :  { %v2076_v26 = vmul.f32 0.03125, %v2075_v30 }
 0x880   :  { %v2077_v2 = vsub.f32 %v2072_v20, %v2076_v26 }
 0x882   :  { %v2078_v28 = vmul.f32 %v2077_v2, %v2077_v2 }
 0x884   :  { %v2079_v33 = vsel %vm64_vm0, %v2078_v28, 0.0 }
 0x885   :  { %2080 = vadd.xlane.f32.xlu1 %v2079_v33 }
 0x912   :  { %v2081_v35 = vpop.xlane.xlu1 %2080 }
 0x913   :  { %v2082_v36 = vmul.f32 0.03125, %v2081_v35 }
 0x915   :  { %v2083_v60 = vadd.f32 1e-05, %v2082_v36 }
 0x917   :  { %2473 = vrsqrt.f32 %v2083_v60 }
 0x921   :  { %v2474_v12 = vpop.eup %2473 }
 0x922   :  { %v2085_v21 = vmul.f32 %v2474_v12, %v2077_v2 }
 0x924   :  { %v2090_v39 = vmul.f32 %v2154_v37, %v2085_v21 }
 0x926   :  { %v2095_v24 = vadd.f32 %v2155_v34, %v2090_v39 }
 0x928   :  { %2096 = vst.msk [vmem:[#allocation2] sm:$0xff] %vm64_vm0, %v2095_v24 }
 0x929   :  { %2486 = shalt.err (!%p2483_p4)
}
 0x92a   :  { %s2487_s22 = scalar_lea.hbm %s2965_s3, 128 }
 0x92b   :  { %p2488_p5 = scmp.ne.s32.totalorder %s2965_s3, %s2487_s22  ;;  %p2491_p6 = scmp.lt.u32.totalorder %s2487_s22, %s2965_s3 }
 0x92d   :  { %p2493_p7 = pnand %p2491_p6, %p2488_p5 }
 0x92f   :  { %2496 = shalt.err (!%p2493_p7)
}
 0x930   :  { %2106 = dma.vmem_to_hbm [thread:$0]  %s2104_s18, 128, %s2965_s3, [#allocation3]  }
 0x931   :  { %2497 = dma.done.wait [#allocation3], 128  }
 0x932   :  { %2498 = vsyncadd [#allocation3], 4294967168 }
 0x933   :  { %2110 = vsyncpa [#allocation3], 1 }

</bundles_post_ra>
